<compile_context>
chip_gen: v7x
topology: tpu7x:2x2x1
jax: 0.10.0
libtpu: 0.0.40
codegen_flags: <defaults>
</compile_context>

<pallas_src>
import functools
import math

import jax
import jax.numpy as jnp
from jax.experimental import pallas as pl
from jax.experimental.pallas import tpu as pltpu

_EPS = 1e-7
_VMEM_LIMIT = 32 * 1024 * 1024  # safe scoped-VMEM cap on v5e / v6e / v7x


# ----------------------------------------------------------------------------
# Kernels
# ----------------------------------------------------------------------------
def _l2norm_kernel(l_ref, ab_ref, ol_ref, oab_ref, *, eps):
    # blocks: (TB, D) rows; lane axis = feat_dim
    l = l_ref[...].astype(jnp.float32)
    ab = ab_ref[...].astype(jnp.float32)
    ol_ref[...] = l / (jnp.sqrt(jnp.sum(l * l, axis=-1, keepdims=True)) + eps)
    oab_ref[...] = ab / (jnp.sqrt(jnp.sum(ab * ab, axis=-1, keepdims=True)) + eps)


def _score_kernel(idx_ref, mem_ab_ref, mem_l_ref, l_ref, ab_ref,
                  out_l_ref, out_ab_ref, *, inv_t, kp1):
    # grid = (B, K+1); mem_*_ref are the gathered rows memory_*[idx[b, k]]
    # out_*_ref are lane-dense (1, K+1) rows resident across the k axis.
    k = pl.program_id(1)

    @pl.when(k == 0)
    def _init():
        out_l_ref[...] = jnp.zeros_like(out_l_ref)
        out_ab_ref[...] = jnp.zeros_like(out_ab_ref)

    w_ab = mem_ab_ref[...].astype(jnp.float32)   # (1, D)
    w_l = mem_l_ref[...].astype(jnp.float32)     # (1, D)
    l = l_ref[...].astype(jnp.float32)           # (1, D)
    ab = ab_ref[...].astype(jnp.float32)         # (1, D)

    s_l = jnp.sum(w_ab * l, axis=-1, keepdims=True) * inv_t    # (1, 1)
    s_ab = jnp.sum(w_l * ab, axis=-1, keepdims=True) * inv_t   # (1, 1)

    lane = jax.lax.broadcasted_iota(jnp.int32, (1, kp1), 1)
    sel = lane == k
    out_l_ref[...] = jnp.where(sel, s_l, out_l_ref[...])
    out_ab_ref[...] = jnp.where(sel, s_ab, out_ab_ref[...])


def _mem_update_kernel(y_ref, mem_l_ref, mem_ab_ref, l_ref, ab_ref,
                       upd_l_ref, upd_ab_ref, *, momentum):
    # grid = (B,); mem_*_ref are the gathered rows memory_*[y[b]]
    l_pos = mem_l_ref[...].astype(jnp.float32)
    ab_pos = mem_ab_ref[...].astype(jnp.float32)
    l = l_ref[...].astype(jnp.float32)
    ab = ab_ref[...].astype(jnp.float32)
    l_new = l_pos * momentum + l * (1.0 - momentum)
    ab_new = ab_pos * momentum + ab * (1.0 - momentum)
    upd_l_ref[...] = l_new / jnp.sqrt(jnp.sum(l_new * l_new, axis=-1, keepdims=True))
    upd_ab_ref[...] = ab_new / jnp.sqrt(jnp.sum(ab_new * ab_new, axis=-1, keepdims=True))


# ----------------------------------------------------------------------------
# Pallas wrappers
# ----------------------------------------------------------------------------
def _l2_normalize(l, ab, eps):
    B, D = l.shape
    tb = min(B, 256)                      # full rows if B small, 8-aligned otherwise
    grid = (pl.cdiv(B, tb),)
    return pl.pallas_call(
        functools.partial(_l2norm_kernel, eps=eps),
        out_shape=(jax.ShapeDtypeStruct((B, D), jnp.float32),
                   jax.ShapeDtypeStruct((B, D), jnp.float32)),
        grid=grid,
        in_specs=[pl.BlockSpec((tb, D), lambda i: (i, 0)),
                  pl.BlockSpec((tb, D), lambda i: (i, 0))],
        out_specs=(pl.BlockSpec((tb, D), lambda i: (i, 0)),
                   pl.BlockSpec((tb, D), lambda i: (i, 0))),
        compiler_params=pltpu.CompilerParams(
            dimension_semantics=("parallel",),
            vmem_limit_bytes=_VMEM_LIMIT),
    )(l, ab)


def _scores(idx, memory_ab, memory_l, l_n, ab_n, inv_t):
    B, D = l_n.shape
    kp1 = idx.shape[1]
    cost = pl.CostEstimate(
        flops=4 * B * kp1 * D,
        transcendentals=0,
        bytes_accessed=4 * (2 * B * kp1 * D + 2 * B * D + 3 * B * kp1),
    )
    return pl.pallas_call(
        functools.partial(_score_kernel, inv_t=inv_t, kp1=kp1),
        out_shape=(jax.ShapeDtypeStruct((B, kp1), jnp.float32),
                   jax.ShapeDtypeStruct((B, kp1), jnp.float32)),
        grid_spec=pltpu.PrefetchScalarGridSpec(
            num_scalar_prefetch=1,            # idx -> SMEM, drives the gathers
            grid=(B, kp1),
            in_specs=[
                pl.BlockSpec((1, D), lambda b, k, idx_ref: (idx_ref[b, k], 0)),  # memory_ab row
                pl.BlockSpec((1, D), lambda b, k, idx_ref: (idx_ref[b, k], 0)),  # memory_l  row
                pl.BlockSpec((1, D), lambda b, k, idx_ref: (b, 0)),              # l_n[b]
                pl.BlockSpec((1, D), lambda b, k, idx_ref: (b, 0)),              # ab_n[b]
            ],
            out_specs=(
                pl.BlockSpec((1, kp1), lambda b, k, idx_ref: (b, 0)),
                pl.BlockSpec((1, kp1), lambda b, k, idx_ref: (b, 0)),
            ),
        ),
        compiler_params=pltpu.CompilerParams(
            dimension_semantics=("parallel", "arbitrary"),
            vmem_limit_bytes=_VMEM_LIMIT),
        cost_estimate=cost,
    )(idx, memory_ab, memory_l, l_n, ab_n)


def _memory_update(y, memory_l, memory_ab, l_n, ab_n, momentum):
    B, D = l_n.shape
    return pl.pallas_call(
        functools.partial(_mem_update_kernel, momentum=momentum),
        out_shape=(jax.ShapeDtypeStruct((B, D), jnp.float32),
                   jax.ShapeDtypeStruct((B, D), jnp.float32)),
        grid_spec=pltpu.PrefetchScalarGridSpec(
            num_scalar_prefetch=1,            # y -> SMEM, drives the row gathers
            grid=(B,),
            in_specs=[
                pl.BlockSpec((1, D), lambda b, y_ref: (y_ref[b], 0)),   # memory_l[y[b]]
                pl.BlockSpec((1, D), lambda b, y_ref: (y_ref[b], 0)),   # memory_ab[y[b]]
                pl.BlockSpec((1, D), lambda b, y_ref: (b, 0)),          # l_n[b]
                pl.BlockSpec((1, D), lambda b, y_ref: (b, 0)),          # ab_n[b]
            ],
            out_specs=(pl.BlockSpec((1, D), lambda b, y_ref: (b, 0)),
                       pl.BlockSpec((1, D), lambda b, y_ref: (b, 0))),
        ),
        compiler_params=pltpu.CompilerParams(
            dimension_semantics=("parallel",),
            vmem_limit_bytes=_VMEM_LIMIT),
    )(y, memory_l, memory_ab, l_n, ab_n)


def cmc_score_softmax_forward(l, ab, y, idx, memory_l, memory_ab, *,
                              T=0.1, momentum=0.5, eps=_EPS):
    """Functional forward. Returns (out_l, out_ab, new_memory_l, new_memory_ab)."""
    B, _ = l.shape
    kp1 = idx.shape[1]
    idx = idx.astype(jnp.int32)
    y = y.astype(jnp.int32)

    l_n, ab_n = _l2_normalize(l, ab, eps)
    out_l, out_ab = _scores(idx, memory_ab, memory_l, l_n, ab_n, 1.0 / float(T))

    upd_l, upd_ab = _memory_update(y, memory_l, memory_ab, l_n, ab_n, float(momentum))
    # TODO(synk): final row scatter done with XLA (.at[y].set) — equivalent to
    # torch index_copy_ (undefined tie-break if y has duplicates, same as torch).
    new_memory_l = memory_l.at[y].set(upd_l)
    new_memory_ab = memory_ab.at[y].set(upd_ab)

    return (out_l.reshape(B, kp1, 1), out_ab.reshape(B, kp1, 1),
            new_memory_l, new_memory_ab)


class CMCScoreSoftmax:
    """JAX/Pallas port of CMCScore_softmax; memory banks carried as JAX arrays."""

    def __init__(self, feat_dim, N, K, T=0.1, momentum=0.5, *, key):
        self.N, self.K, self.feat_dim = N, K, feat_dim
        self.T, self.momentum, self.eps = float(T), float(momentum), _EPS
        stdv = 1.0 / math.sqrt(feat_dim / 3)
        k1, k2 = jax.random.split(key)
        self.memory_l = jax.random.uniform(k1, (N, feat_dim), jnp.float32, -stdv, stdv)
        self.memory_ab = jax.random.uniform(k2, (N, feat_dim), jnp.float32, -stdv, stdv)

    def forward(self, l, ab, y, idx=None, *, key=None):
        if idx is None:
            # torch.multinomial over uniform `ones` == uniform sampling over [0, N)
            assert key is not None, "pass a PRNG key to sample negatives"
            idx = jax.random.randint(key, (l.shape[0], self.K + 1), 0, self.N,
                                     dtype=jnp.int32)
            idx = idx.at[:, 0].set(y.astype(jnp.int32))
        out_l, out_ab, self.memory_l, self.memory_ab = cmc_score_softmax_forward(
            l, ab, y, idx, self.memory_l, self.memory_ab,
            T=self.T, momentum=self.momentum, eps=self.eps)
        return out_l, out_ab


# ----------------------------------------------------------------------------
# Plain-JAX reference (for verification)
# ----------------------------------------------------------------------------
def cmc_forward_ref(l, ab, y, idx, memory_l, memory_ab, *, T, momentum, eps):
    B, D = l.shape
    kp1 = idx.shape[1]
    l_n = l / (jnp.sqrt(jnp.sum(l * l, axis=1, keepdims=True)) + eps)
    ab_n = ab / (jnp.sqrt(jnp.sum(ab * ab, axis=1, keepdims=True)) + eps)
    w_ab = memory_ab[idx.reshape(-1)].reshape(B, kp1, D)
    w_l = memory_l[idx.reshape(-1)].reshape(B, kp1, D)
    out_l = jnp.sum(w_ab * l_n[:, None, :], axis=-1) / T
    out_ab = jnp.sum(w_l * ab_n[:, None, :], axis=-1) / T
    l_pos = memory_l[y] * momentum + l_n * (1.0 - momentum)
    l_pos = l_pos / jnp.sqrt(jnp.sum(l_pos * l_pos, axis=1, keepdims=True))
    ab_pos = memory_ab[y] * momentum + ab_n * (1.0 - momentum)
    ab_pos = ab_pos / jnp.sqrt(jnp.sum(ab_pos * ab_pos, axis=1, keepdims=True))
    new_memory_l = memory_l.at[y].set(l_pos)
    new_memory_ab = memory_ab.at[y].set(ab_pos)
    return out_l[..., None], out_ab[..., None], new_memory_l, new_memory_ab


if __name__ == "__main__":
    key = jax.random.PRNGKey(0)
    k_mem, k_l, k_ab, k_idx = jax.random.split(key, 4)

    feat_dim, N, K, B = 128, 256, 7, 4
    T, momentum = 0.1, 0.5

    module = CMCScoreSoftmax(feat_dim, N, K, T=T, momentum=momentum, key=k_mem)
    mem_l0, mem_ab0 = module.memory_l, module.memory_ab

    l = jax.random.normal(k_l, (B, feat_dim), dtype=jnp.float32)
    ab = jax.random.normal(k_ab, (B, feat_dim), dtype=jnp.float32)
    y = (jnp.arange(B, dtype=jnp.int32) * 7) % N               # distinct positives
    idx = jax.random.randint(k_idx, (B, K + 1), 0, N, dtype=jnp.int32)
    idx = idx.at[:, 0].set(y)

    out_l, out_ab = module.forward(l, ab, y, idx=idx)
    jax.block_until_ready((out_l, out_ab, module.memory_l, module.memory_ab))

    ref_l, ref_ab, ref_mem_l, ref_mem_ab = cmc_forward_ref(
        l, ab, y, idx, mem_l0, mem_ab0, T=T, momentum=momentum, eps=_EPS)

    assert out_l.shape == (B, K + 1, 1) and out_ab.shape == (B, K + 1, 1)
    assert jnp.allclose(out_l, ref_l, rtol=1e-5, atol=1e-4), (out_l, ref_l)
    assert jnp.allclose(out_ab, ref_ab, rtol=1e-5, atol=1e-4), (out_ab, ref_ab)
    assert jnp.allclose(module.memory_l, ref_mem_l, rtol=1e-5, atol=1e-5)
    assert jnp.allclose(module.memory_ab, ref_mem_ab, rtol=1e-5, atol=1e-5)

    print("KERNEL_OK")
</pallas_src>

<mosaic_0001>
module attributes {stable_mosaic.version = 11 : i64} {
  func.func @_l2norm_kernel(%arg0: i32, %arg1: memref<4x128xf32, #tpu.memory_space<vmem>>, %arg2: memref<4x128xf32, #tpu.memory_space<vmem>>, %arg3: memref<4x128xf32, #tpu.memory_space<vmem>>, %arg4: memref<4x128xf32, #tpu.memory_space<vmem>>) attributes {dimension_semantics = [#tpu.dimension_semantics<parallel>], iteration_bounds = array<i64: 1>, scalar_prefetch = 0 : i64, scratch_operands = 0 : i64, tpu.core_type = #tpu.core_type<tc>, window_params = [{transform_indices = @transform_0, window_bounds = array<i64: 4, 128>}, {transform_indices = @transform_1, window_bounds = array<i64: 4, 128>}, {transform_indices = @transform_2, window_bounds = array<i64: 4, 128>}, {transform_indices = @transform_3, window_bounds = array<i64: 4, 128>}]} {
    %c0 = arith.constant 0 : index
    %c0_0 = arith.constant 0 : index
    %0 = vector.load %arg1[%c0, %c0_0] : memref<4x128xf32, #tpu.memory_space<vmem>>, vector<4x128xf32>
    %c0_1 = arith.constant 0 : index
    %c0_2 = arith.constant 0 : index
    %1 = vector.load %arg2[%c0_1, %c0_2] : memref<4x128xf32, #tpu.memory_space<vmem>>, vector<4x128xf32>
    %2 = arith.mulf %0, %0 : vector<4x128xf32>
    %cst = arith.constant dense<0.000000e+00> : vector<4xf32>
    %3 = vector.multi_reduction <add>, %2, %cst [1] : vector<4x128xf32> to vector<4xf32>
    %4 = vector.shape_cast %3 : vector<4xf32> to vector<4x1xf32>
    %5 = math.sqrt %4 : vector<4x1xf32>
    %cst_3 = arith.constant 1.000000e-07 : f32
    %6 = vector.broadcast %cst_3 : f32 to vector<4x1xf32>
    %7 = arith.addf %5, %6 : vector<4x1xf32>
    %8 = vector.broadcast %7 : vector<4x1xf32> to vector<4x128xf32>
    %9 = arith.divf %0, %8 : vector<4x128xf32>
    %c0_4 = arith.constant 0 : index
    %c0_5 = arith.constant 0 : index
    %10 = vector.load %arg3[%c0_4, %c0_5] : memref<4x128xf32, #tpu.memory_space<vmem>>, vector<4x128xf32>
    tpu.vector_store %arg3[%c0_4, %c0_5], %9 {strides = array<i32>} : memref<4x128xf32, #tpu.memory_space<vmem>>, vector<4x128xf32>,
    %11 = arith.mulf %1, %1 : vector<4x128xf32>
    %cst_6 = arith.constant dense<0.000000e+00> : vector<4xf32>
    %12 = vector.multi_reduction <add>, %11, %cst_6 [1] : vector<4x128xf32> to vector<4xf32>
    %13 = vector.shape_cast %12 : vector<4xf32> to vector<4x1xf32>
    %14 = math.sqrt %13 : vector<4x1xf32>
    %cst_7 = arith.constant 1.000000e-07 : f32
    %15 = vector.broadcast %cst_7 : f32 to vector<4x1xf32>
    %16 = arith.addf %14, %15 : vector<4x1xf32>
    %17 = vector.broadcast %16 : vector<4x1xf32> to vector<4x128xf32>
    %18 = arith.divf %1, %17 : vector<4x128xf32>
    %c0_8 = arith.constant 0 : index
    %c0_9 = arith.constant 0 : index
    %19 = vector.load %arg4[%c0_8, %c0_9] : memref<4x128xf32, #tpu.memory_space<vmem>>, vector<4x128xf32>
    tpu.vector_store %arg4[%c0_8, %c0_9], %18 {strides = array<i32>} : memref<4x128xf32, #tpu.memory_space<vmem>>, vector<4x128xf32>,
    return
  }
  func.func @transform_0(%arg0: i32) -> (i32, i32) {
    %c0_i32 = arith.constant 0 : i32
    %c0_i32_0 = arith.constant 0 : i32
    return %arg0, %c0_i32 : i32, i32
  }
  func.func @transform_1(%arg0: i32) -> (i32, i32) {
    %c0_i32 = arith.constant 0 : i32
    %c0_i32_0 = arith.constant 0 : i32
    return %arg0, %c0_i32 : i32, i32
  }
  func.func @transform_2(%arg0: i32) -> (i32, i32) {
    %c0_i32 = arith.constant 0 : i32
    %c0_i32_0 = arith.constant 0 : i32
    return %arg0, %c0_i32 : i32, i32
  }
  func.func @transform_3(%arg0: i32) -> (i32, i32) {
    %c0_i32 = arith.constant 0 : i32
    %c0_i32_0 = arith.constant 0 : i32
    return %arg0, %c0_i32 : i32, i32
  }
}

</mosaic_0001>

<bundles_post_ra>
// kernel: tpu_custom_call.1
= control target key start
LH: loop header
LB: loop body
LE: loop exit
PB: predicated region body
PF: predicated region fallthrough
CT: control target
= control target key end

     0   :  { %9 = vsyncpa [#allocation3], 0  ;;  %s282_s0 = inlined_call_operand.hbm [shape: f32[4,128], index: 0, kind: input, shape index: {}]   ;;  %s283_s1 = inlined_call_operand.hbm [shape: f32[4,128], index: 1, kind: input, shape index: {}]   ;;  %s284_s2 = inlined_call_operand.hbm [shape: f32[4,128], index: 2, kind: output, shape index: {0}]   ;;  %s285_s3 = inlined_call_operand.hbm [shape: f32[4,128], index: 3, kind: output, shape index: {1}]  }
   0x1   :  { %10 = vsyncpa [#allocation6], 0 }
   0x2   :  { %11 = vsyncpa [#allocation4], 0 }
   0x3   :  { %12 = vsyncpa [#allocation9], 0  ;;  %s210_s12 = smov [#allocation2]   ;;  %s211_s14 = smov [#allocation5]  }
   0x4   :  { %s19_s13 = sshll.u32 %s210_s12, 4  ;;  %s29_s15 = sshll.u32 %s211_s14, 4  ;;  %s20_s13 = int_to_ptr.vmem [resolvable:$true] %s19_s13  ;;  %s30_s15 = int_to_ptr.vmem [resolvable:$true] %s29_s15 }
   0x5   :  { %s114_s18 = scalar_lea.hbm %s282_s0, 64 }
   0x6   :  { %p115_p0 = scmp.ne.s32.totalorder %s282_s0, %s114_s18  ;;  %p118_p1 = scmp.lt.u32.totalorder %s114_s18, %s282_s0 }
   0x8   :  { %p120_p2 = pnand %p118_p1, %p115_p0 }
   0xa   :  { %123 = shalt.err (!%p120_p2)
}
   0xb   :  { %s124_s23 = scalar_lea.vmem %s20_s13, 64  ;;  %p129_p4 = scmp.lt.s32.totalorder %s20_s13, %s20_s13 }
   0xc   :  { %p125_p3 = scmp.ne.s32.totalorder %s20_s13, %s124_s23  ;;  %p130_p5 = scmp.lt.s32.totalorder %s124_s23, %s124_s23 }
   0xe   :  { %p131_p6 = por %p130_p5, %p129_p4 }
  0x10   :  { %p132_p7 = pnand %p131_p6, %p125_p3 }
  0x12   :  { %135 = shalt.err (!%p132_p7)
}
  0x13   :  { %22 = dma.hbm_to_vmem [thread:$0]  %s282_s0, 64, %s20_s13, [#allocation3]  }
  0x14   :  { %s136_s28 = scalar_lea.hbm %s283_s1, 64 }
  0x15   :  { %p137_p8 = scmp.ne.s32.totalorder %s283_s1, %s136_s28  ;;  %p140_p9 = scmp.lt.u32.totalorder %s136_s28, %s283_s1 }
  0x17   :  { %p142_p10 = pnand %p140_p9, %p137_p8 }
  0x19   :  { %145 = shalt.err (!%p142_p10)
}
  0x1a   :  { %s146_s6 = scalar_lea.vmem %s30_s15, 64  ;;  %p151_p12 = scmp.lt.s32.totalorder %s30_s15, %s30_s15 }
  0x1b   :  { %p147_p11 = scmp.ne.s32.totalorder %s30_s15, %s146_s6  ;;  %p152_p13 = scmp.lt.s32.totalorder %s146_s6, %s146_s6 }
  0x1d   :  { %p153_p0 = por %p152_p13, %p151_p12 }
  0x1f   :  { %p154_p1 = pnand %p153_p0, %p147_p11 }
  0x21   :  { %157 = shalt.err (!%p154_p1)
}
  0x22   :  { %32 = dma.hbm_to_vmem [thread:$0]  %s283_s1, 64, %s30_s15, [#allocation6]  }
  0x23   :  { %202 = dma.done.wait [#allocation3], 64  }
  0x24   :  { %203 = vsyncadd [#allocation3], 4294967232 }
  0x25   :  { %204 = dma.done.wait [#allocation6], 64  }
  0x26   :  { %205 = vsyncadd [#allocation6], 4294967232  ;;  %v39_v0 = vld [vmem:[#allocation2] sm:$0xf]  ;;  %vm42_vm0 = vcmask 1043456   ;;  %s212_s1 = smov [#allocation7]  }
  0x27   :  { %v40_v1 = vld [vmem:[#allocation5] sm:$0xf]  ;;  %v41_v2 = vmul.f32 %v39_v0, %v39_v0  ;;  %s78_s8 = sshll.u32 %s212_s1, 4  ;;  %s213_s9 = smov [#allocation8]   ;;  %s79_s8 = int_to_ptr.vmem [resolvable:$true] %s78_s8 }
  0x28   :  { %v57_v3 = vmul.f32 %v40_v1, %v40_v1  ;;  %s88_s10 = sshll.u32 %s213_s9, 4  ;;  %s158_s11 = scalar_lea.vmem %s79_s8, 64  ;;  %s89_s10 = int_to_ptr.vmem [resolvable:$true] %s88_s10 }
  0x29   :  { %v43_v4 = vsel %vm42_vm0, %v41_v2, 0.0  ;;  %p159_p2 = scmp.ne.s32.totalorder %s79_s8, %s158_s11  ;;  %p163_p3 = scmp.lt.s32.totalorder %s79_s8, %s79_s8 }
  0x2a   :  { %44 = vadd.xlane.f32.xlu0 %v43_v4  ;;  %v58_v5 = vsel %vm42_vm0, %v57_v3, 0.0  ;;  %p164_p4 = scmp.lt.s32.totalorder %s158_s11, %s158_s11 }
  0x2c   :  { %p165_p5 = por %p164_p4, %p163_p3 }
  0x2e   :  { %59 = vadd.xlane.f32.xlu0 %v58_v5  ;;  %p166_p6 = pnand %p165_p5, %p159_p2 }
  0xb7   :  { %v45_v6 = vpop.xlane.xlu0 %44 }
  0xb8   :  { %106 = vrsqrt.f32 %v45_v6  ;;  %vm48_vm1 = vcmp.eq.f32.partialorder %v45_v6, inf  ;;  %v51_v10 = vand.u32 2147483648, %v45_v6  ;;  %vm50_vm2 = vcmp.eq.f32.partialorder %v45_v6, 0.0 }
  0xbb   :  { %v60_v7 = vpop.xlane.xlu0 %59 }
  0xbc   :  { %108 = vrsqrt.f32 %v60_v7  ;;  %vm63_vm3 = vcmp.eq.f32.partialorder %v60_v7, inf  ;;  %v66_v16 = vand.u32 2147483648, %v60_v7  ;;  %vm65_vm4 = vcmp.eq.f32.partialorder %v60_v7, 0.0 }
  0xc2   :  { %v107_v8 = vpop.eup %106 }
  0xc3   :  { %v47_v9 = vmul.f32 %v107_v8, %v45_v6 }
  0xc5   :  { %v49_v11 = vsel %vm48_vm1, %v45_v6, %v47_v9 }
  0xc6   :  { %v109_v12 = vpop.eup %108  ;;  %v52_v13 = vsel %vm50_vm2, %v51_v10, %v49_v11 }
  0xc7   :  { %v53_v14 = vadd.f32 1e-07, %v52_v13  ;;  %v62_v15 = vmul.f32 %v109_v12, %v60_v7 }
  0xc9   :  { %v64_v17 = vsel %vm63_vm3, %v60_v7, %v62_v15  ;;  %110 = vrcp.f32 %v53_v14 }
  0xca   :  { %v67_v18 = vsel %vm65_vm4, %v66_v16, %v64_v17 }
  0xcb   :  { %v68_v19 = vadd.f32 1e-07, %v67_v18 }
  0xcd   :  { %112 = vrcp.f32 %v68_v19 }
  0xd3   :  { %v111_v20 = vpop.eup %110 }
  0xd4   :  { %v55_v21 = vmul.f32 %v111_v20, %v39_v0 }
  0xd6   :  { %56 = vst [vmem:[#allocation7] sm:$0xf] %v55_v21 }
  0xd7   :  { %v113_v22 = vpop.eup %112 }
  0xd8   :  { %169 = shalt.err (!%p166_p6)
}
  0xd9   :  { %s170_s14 = scalar_lea.hbm %s284_s2, 64 }
  0xda   :  { %p171_p7 = scmp.ne.s32.totalorder %s284_s2, %s170_s14  ;;  %p174_p8 = scmp.lt.u32.totalorder %s170_s14, %s284_s2 }
  0xdc   :  { %p176_p9 = pnand %p174_p8, %p171_p7 }
  0xde   :  { %179 = shalt.err (!%p176_p9)
}
  0xdf   :  { %81 = dma.vmem_to_hbm [thread:$0]  %s79_s8, 64, %s284_s2, [#allocation4]   ;;  %v70_v23 = vmul.f32 %v113_v22, %v40_v1 }
  0xe0   :  { %s180_s21 = scalar_lea.vmem %s89_s10, 64  ;;  %p185_p11 = scmp.lt.s32.totalorder %s89_s10, %s89_s10 }
  0xe1   :  { %71 = vst [vmem:[#allocation8] sm:$0xf] %v70_v23  ;;  %p181_p10 = scmp.ne.s32.totalorder %s89_s10, %s180_s21  ;;  %p186_p12 = scmp.lt.s32.totalorder %s180_s21, %s180_s21 }
  0xe3   :  { %p187_p13 = por %p186_p12, %p185_p11 }
  0xe5   :  { %p188_p0 = pnand %p187_p13, %p181_p10 }
  0xe7   :  { %191 = shalt.err (!%p188_p0)
}
  0xe8   :  { %s192_s24 = scalar_lea.hbm %s285_s3, 64 }
  0xe9   :  { %p193_p1 = scmp.ne.s32.totalorder %s285_s3, %s192_s24  ;;  %p196_p2 = scmp.lt.u32.totalorder %s192_s24, %s285_s3 }
  0xeb   :  { %p198_p3 = pnand %p196_p2, %p193_p1 }
  0xed   :  { %201 = shalt.err (!%p198_p3)
}
  0xee   :  { %91 = dma.vmem_to_hbm [thread:$0]  %s89_s10, 64, %s285_s3, [#allocation9]  }
  0xef   :  { %206 = dma.done.wait [#allocation4], 64  }
  0xf0   :  { %207 = vsyncadd [#allocation4], 4294967232 }
  0xf1   :  { %208 = dma.done.wait [#allocation9], 64  }
  0xf2   :  { %209 = vsyncadd [#allocation9], 4294967232 }
  0xf3   :  { %98 = vsyncpa [#allocation3], 1 }
  0xf4   :  { %99 = vsyncpa [#allocation6], 1 }
  0xf5   :  { %100 = vsyncpa [#allocation4], 1 }
  0xf6   :  { %101 = vsyncpa [#allocation9], 1 }

</bundles_post_ra>
